<compile_context>
chip_gen: v6e
topology: v6e:2x2x1
jax: 0.10.0
libtpu: 0.0.40
codegen_flags: <defaults>
</compile_context>

<pallas_src>
import functools
import math

import jax
import jax.numpy as jnp
from jax.experimental import pallas as pl
from jax.experimental.pallas import tpu as pltpu


def _cdiv(a, b):
    return -(-a // b)


def _round_up(a, m):
    return _cdiv(a, m) * m


# Sublane packing factor per dtype itemsize (rows per 32-bit sublane group).
_SUBLANE_PACK = {1: 32, 2: 16, 4: 8, 8: 8}


def _channels_pool_kernel(x_ref, o_ref, *, kernel_size, stride, c_out, mode,
                          load_once):
    # x_ref: (BT, C, TS)   o_ref: (BT, C_out, TS)
    if load_once:
        # Overlapping stride-1 windows: one block load, slice the value.
        xb = x_ref[...]

        def window(i):
            return xb[:, i:i + c_out, :]
    else:
        def window(i):
            # Rows i, i+stride, ..., i+(c_out-1)*stride (sublane-strided read).
            if stride == 1:
                return x_ref[:, pl.ds(i, c_out), :]
            return x_ref[:, pl.ds(i, c_out, stride=stride), :]

    if mode == "max":
        acc = window(0)
        for i in range(1, kernel_size):
            acc = jnp.maximum(acc, window(i))
        o_ref[...] = acc
    else:  # "avg": accumulate in f32, single cast at the end
        acc = window(0).astype(jnp.float32)
        for i in range(1, kernel_size):
            acc = acc + window(i).astype(jnp.float32)
        o_ref[...] = (acc * (1.0 / kernel_size)).astype(o_ref.dtype)


def _pool_3d(x, kernel_size, stride, c_out, mode):
    """Pool a (B, C, L) array over dim 1. L is the lane (fast) axis."""
    B, C, L = (int(d) for d in x.shape)
    itemsize = jnp.dtype(x.dtype).itemsize
    pack = _SUBLANE_PACK.get(itemsize, 8)
    c_pad = _round_up(C, pack)
    co_pad = _round_up(c_out, pack)

    # Combined (padded) in+out block bytes allowed per grid step; blocks are
    # double-buffered by the pipeline, so ~2x this lands in VMEM.
    budget = 8 * 1024 * 1024

    def item_bytes(ts):
        return (c_pad + co_pad) * _round_up(ts, 128) * itemsize

    if item_bytes(L) <= budget:
        # One batch item fits: keep each item's (C, L) slab fully contiguous
        # (one big DMA per item) and tile the batch dimension only.
        ts = L
        bt = max(1, min(B, budget // item_bytes(L)))
    else:
        # A single item exceeds the budget: bt=1 and the largest
        # multiple-of-128 spatial tile that fits (floored at 128 lanes).
        bt = 1
        ts = max(128, (budget // ((c_pad + co_pad) * itemsize)) // 128 * 128)
        if ts >= L:
            ts = L

    n_s = _cdiv(L, ts)
    # v7x has 2 TensorCores: make sure a "parallel" axis has >= 2 steps when
    # there is any batch to split (harmless single extra step on v5e/v6e).
    if n_s == 1 and B > 1:
        bt = min(bt, _cdiv(B, 2))
    n_b = _cdiv(B, bt)

    block_bytes = bt * item_bytes(ts)
    vmem_limit = int(min(max(32 << 20, 3 * block_bytes), 56 << 20))

    kernel = functools.partial(
        _channels_pool_kernel,
        kernel_size=kernel_size, stride=stride, c_out=c_out, mode=mode,
        load_once=(stride == 1 and kernel_size > 1))

    return pl.pallas_call(
        kernel,
        out_shape=jax.ShapeDtypeStruct((B, c_out, L), x.dtype),
        grid_spec=pl.GridSpec(
            grid=(n_b, n_s),
            in_specs=[pl.BlockSpec((bt, C, ts), lambda b, s: (b, 0, s))],
            out_specs=pl.BlockSpec((bt, c_out, ts), lambda b, s: (b, 0, s)),
        ),
        compiler_params=pltpu.CompilerParams(
            dimension_semantics=("parallel", "parallel"),
            vmem_limit_bytes=vmem_limit,
        ),
        cost_estimate=pl.CostEstimate(
            flops=B * c_out * L * max(kernel_size - 1, 1),
            transcendentals=0,
            bytes_accessed=(B * C * L + B * c_out * L) * itemsize,
        ),
    )(x)


def channels_pool(x, kernel_size, stride=None, mode="max"):
    """Pool x ([N, C, *spatial]) over dim 1 with a 1-D max/avg pool."""
    if stride is None:
        stride = kernel_size
    assert mode in ("max", "avg")
    # TODO(synk): padding / dilation / ceil_mode / count_include_pad of
    # nn.MaxPool1d / nn.AvgPool1d are not implemented (PyTorch defaults assumed).
    N, C = int(x.shape[0]), int(x.shape[1])
    spatial = tuple(int(d) for d in x.shape[2:])
    hw = int(math.prod(spatial)) if spatial else 1
    c_out = (C - kernel_size) // stride + 1
    assert c_out >= 1, "pool window larger than channel count"
    xr = x.reshape(N, C, hw)

    if hw < 128:
        # Lane-dense repack: fold batch into the lane axis so all 128 lanes
        # are live.  Pooling is over C only, so columns stay independent.
        x_in = jnp.transpose(xr, (1, 0, 2)).reshape(1, C, N * hw)
        y = _pool_3d(x_in, kernel_size, stride, c_out, mode)  # (1, c_out, N*hw)
        y = jnp.transpose(y.reshape(c_out, N, hw), (1, 0, 2))
    else:
        y = _pool_3d(xr, kernel_size, stride, c_out, mode)

    return y.reshape((N, c_out) + spatial)


def _channels_pool_ref(x, kernel_size, stride, mode):
    """Plain-JAX reference (== torch MaxPool1d/AvgPool1d applied over dim 1)."""
    C = x.shape[1]
    c_out = (C - kernel_size) // stride + 1
    wins = jnp.stack(
        [jax.lax.slice_in_dim(x, i * stride, i * stride + kernel_size, axis=1)
         for i in range(c_out)], axis=1)            # (N, c_out, k, *spatial)
    if mode == "max":
        return wins.max(axis=2)
    return wins.mean(axis=2).astype(x.dtype)


if __name__ == "__main__":
    key = jax.random.PRNGKey(0)
    cases = [
        # (shape,          k, s, mode)  -- first case is the module docstring example
        ((2, 8, 4, 4),    2, 2, "max"),   # ChannelsPool(nn.MaxPool1d(2, 2)), repacked path
        ((2, 8, 4, 4),    2, 2, "avg"),   # ChannelsPool(nn.AvgPool1d(2, 2))
        ((2, 8, 4, 4),    3, 1, "max"),   # overlapping window (load-once path)
        ((2, 32, 4, 4),   4, 4, "avg"),
        ((2, 16, 8, 32),  2, 2, "max"),   # hw=256: lane-dense direct path
        ((4, 8, 8, 16),   2, 2, "avg"),   # hw=128: batch tiling / 2-step grid
    ]
    for shape, k, s, mode in cases:
        key, sub = jax.random.split(key)
        x = jax.random.normal(sub, shape, dtype=jnp.float32)
        y = channels_pool(x, k, stride=s, mode=mode)
        jax.block_until_ready(y)
        y_ref = _channels_pool_ref(x, k, s, mode)
        assert y.shape == y_ref.shape, (y.shape, y_ref.shape)
        assert jnp.allclose(y, y_ref, atol=1e-6, rtol=1e-6), \
            f"mismatch: shape={shape} k={k} s={s} mode={mode}"
    print("KERNEL_OK")
</pallas_src>

<mosaic_0001>
module attributes {stable_mosaic.version = 11 : i64} {
  func.func @_channels_pool_kernel(%arg0: i32, %arg1: i32, %arg2: memref<1x8x32xf32, #tpu.memory_space<vmem>>, %arg3: memref<1x4x32xf32, #tpu.memory_space<vmem>>) attributes {dimension_semantics = [#tpu.dimension_semantics<parallel>, #tpu.dimension_semantics<parallel>], iteration_bounds = array<i64: 1, 1>, scalar_prefetch = 0 : i64, scratch_operands = 0 : i64, tpu.core_type = #tpu.core_type<tc>, window_params = [{transform_indices = @transform_0, window_bounds = array<i64: 1, 8, 32>}, {transform_indices = @transform_1, window_bounds = array<i64: 1, 4, 32>}]} {
    %c0 = arith.constant 0 : index
    %c0_0 = arith.constant 0 : index
    %c0_1 = arith.constant 0 : index
    %0 = tpu.strided_load %arg2[%c0, %c0_0, %c0_1] {strides = array<i32: 1, 2, 1>} : memref<1x8x32xf32, #tpu.memory_space<vmem>>, vector<1x4x32xf32>
    %c0_2 = arith.constant 0 : index
    %c1 = arith.constant 1 : index
    %c0_3 = arith.constant 0 : index
    %1 = tpu.strided_load %arg2[%c0_2, %c1, %c0_3] {strides = array<i32: 1, 2, 1>} : memref<1x8x32xf32, #tpu.memory_space<vmem>>, vector<1x4x32xf32>
    %2 = arith.maximumf %0, %1 : vector<1x4x32xf32>
    %c0_4 = arith.constant 0 : index
    %c0_5 = arith.constant 0 : index
    %c0_6 = arith.constant 0 : index
    %3 = vector.load %arg3[%c0_4, %c0_5, %c0_6] : memref<1x4x32xf32, #tpu.memory_space<vmem>>, vector<1x4x32xf32>
    tpu.vector_store %arg3[%c0_4, %c0_5, %c0_6], %2 {strides = array<i32>} : memref<1x4x32xf32, #tpu.memory_space<vmem>>, vector<1x4x32xf32>,
    return
  }
  func.func @transform_0(%arg0: i32, %arg1: i32) -> (i32, i32, i32) {
    %c0_i32 = arith.constant 0 : i32
    %c0_i32_0 = arith.constant 0 : i32
    return %arg0, %c0_i32, %arg1 : i32, i32, i32
  }
  func.func @transform_1(%arg0: i32, %arg1: i32) -> (i32, i32, i32) {
    %c0_i32 = arith.constant 0 : i32
    %c0_i32_0 = arith.constant 0 : i32
    return %arg0, %c0_i32, %arg1 : i32, i32, i32
  }
}

</mosaic_0001>

<bundles_post_ra>
// kernel: tpu_custom_call.1
= control target key start
LH: loop header
LB: loop body
LE: loop exit
PB: predicated region body
PF: predicated region fallthrough
CT: control target
= control target key end

     0   :  { %6 = vsyncpa [#allocation3], 0  ;;  %s106_s0 = inlined_call_operand.hbm [shape: f32[1,8,32], index: 0, kind: input, shape index: {}]   ;;  %s107_s1 = inlined_call_operand.hbm [shape: f32[1,4,32], index: 1, kind: output, shape index: {}]  }
   0x1   :  { %7 = vsyncpa [#allocation4], 0  ;;  %s88_s6 = smov [#allocation2]  }
   0x2   :  { %s14_s7 = sshll.u32 %s88_s6, 4  ;;  %s15_s7 = int_to_ptr.vmem [resolvable:$true] %s14_s7 }
   0x3   :  { %s52_s8 = scalar_lea.vmem %s15_s7, 128  ;;  %p57_p1 = scmp.lt.s32.totalorder %s15_s7, %s15_s7 }
   0x4   :  { %p53_p0 = scmp.ne.s32.totalorder %s15_s7, %s52_s8  ;;  %p58_p2 = scmp.lt.s32.totalorder %s52_s8, %s52_s8 }
   0x6   :  { %p59_p3 = por %p58_p2, %p57_p1 }
   0x8   :  { %p60_p4 = pnand %p59_p3, %p53_p0 }
   0xa   :  { %63 = shalt.err (!%p60_p4)
}
   0xb   :  { %17 = dma.hbm_to_vmem [thread:$0]  %s106_s0, 128, %s15_s7, [#allocation3]  }
   0xc   :  { %84 = dma.done.wait [#allocation3], 128  }
   0xd   :  { %85 = vsyncadd [#allocation3], 4294967168  ;;  %s89_s11 = smov [#allocation5]   ;;  %vm25_vm0 = vcmask 257024  }
   0xe   :  { %s33_s12 = sshll.u32 %s89_s11, 4  ;;  %v21_v0 = vld [vmem:[#allocation2] ss:$2 sm:$0xf]  ;;  %s34_s12 = int_to_ptr.vmem [resolvable:$true] %s33_s12 }
   0xf   :  { %v23_v1 = vld [vmem:[#allocation2 + $0x1] ss:$2 sm:$0xf]  ;;  %s64_s13 = scalar_lea.vmem %s34_s12, 64  ;;  %p69_p6 = scmp.lt.s32.totalorder %s34_s12, %s34_s12 }
  0x10   :  { %v24_v2 = vmax.f32 %v21_v0, %v23_v1  ;;  %p65_p5 = scmp.ne.s32.totalorder %s34_s12, %s64_s13  ;;  %p70_p7 = scmp.lt.s32.totalorder %s64_s13, %s64_s13 }
  0x12   :  { %26 = vst.msk [vmem:[#allocation5] sm:$0xf] %vm25_vm0, %v24_v2  ;;  %p71_p8 = por %p70_p7, %p69_p6 }
  0x14   :  { %p72_p9 = pnand %p71_p8, %p65_p5 }
  0x16   :  { %75 = shalt.err (!%p72_p9)
}
  0x17   :  { %36 = dma.vmem_to_hbm [thread:$0]  %s34_s12, 64, %s107_s1, [#allocation4]  }
  0x18   :  { %86 = dma.done.wait [#allocation4], 64  }
  0x19   :  { %87 = vsyncadd [#allocation4], 4294967232 }
  0x1a   :  { %40 = vsyncpa [#allocation3], 1 }
  0x1b   :  { %41 = vsyncpa [#allocation4], 1 }

</bundles_post_ra>
